<compile_context>
chip_gen: v6e
topology: v6e:2x2x1
jax: 0.10.0
libtpu: 0.0.40
codegen_flags: <defaults>
</compile_context>

<pallas_src>
import functools
import math

import jax
import jax.numpy as jnp
from jax.experimental import pallas as pl
from jax.experimental.pallas import tpu as pltpu

BN_EPS = 1e-5


def _deepset_mil_kernel(bags_ref, wenc_ref, benc_ref, wp1_ref, bp1_ref,
                        wp2_ref, bp2_ref, wr1_ref, br1_ref, wr2_ref, br2_ref,
                        out_ref, acc_ref, *, compute_dtype):
    nt = pl.program_id(1)

    x = bags_ref[0]                                            # (tile_n, F)

    # encoder: Linear -> ReLU (BatchNorm1d eval scale is pre-folded into W/b,
    # Dropout is identity in eval mode).
    emb = jnp.dot(x, wenc_ref[...], preferred_element_type=jnp.float32)
    emb = jnp.maximum(emb + benc_ref[...], 0.0)                # (tile_n, Z) f32

    # deepset_phi: Linear -> ReLU -> Linear
    h = jnp.dot(emb.astype(compute_dtype), wp1_ref[...],
                preferred_element_type=jnp.float32)
    h = jnp.maximum(h + bp1_ref[...], 0.0)
    phi = jnp.dot(h.astype(compute_dtype), wp2_ref[...],
                  preferred_element_type=jnp.float32) + bp2_ref[...]

    # Partial deepset sum-pool over this patch tile, accumulated lane-dense
    # in a persistent f32 VMEM scratch (no tiny masked HBM stores per step).
    part = jnp.sum(phi, axis=0, keepdims=True)                 # (1, Z) f32

    @pl.when(nt == 0)
    def _():
        acc_ref[...] = jnp.zeros_like(acc_ref)

    acc_ref[...] += part

    # deepset_rho on the pooled embedding; write the output exactly once.
    @pl.when(nt == pl.num_programs(1) - 1)
    def _():
        pooled = acc_ref[...]                                  # (1, Z) f32
        r = jnp.dot(pooled.astype(compute_dtype), wr1_ref[...],
                    preferred_element_type=jnp.float32)
        r = jnp.maximum(r + br1_ref[...], 0.0)                 # Dropout = identity
        scores = jnp.dot(r.astype(compute_dtype), wr2_ref[...],
                         preferred_element_type=jnp.float32) + br2_ref[...]
        out_ref[...] = scores.reshape(out_ref.shape).astype(out_ref.dtype)


def _pick_tile_n(n, max_tile):
    """Largest patch-tile that divides N; whole bag if it fits under the cap."""
    if n <= max_tile:
        return n
    for t in range(max_tile, 7, -1):
        if t % 8 == 0 and n % t == 0:
            return t
    # TODO(synk): remainder masking for patch counts with no 8-aligned divisor.
    return n


def deepset_mil_forward(bags, params, *, compute_dtype=jnp.bfloat16,
                        max_tile_n=1024):
    B, N, F = bags.shape
    Z = params['W_enc'].shape[1]
    n_out = params['W_rho2'].shape[1]

    # Fold the eval-mode BatchNorm1d scale 1/sqrt(var+eps) (fresh stats:
    # mean=0, var=1, gamma=1, beta=0) into the encoder Linear.
    c = 1.0 / math.sqrt(1.0 + BN_EPS)
    w_enc = (params['W_enc'] * c).astype(compute_dtype)
    b_enc = (params['b_enc'] * c).astype(jnp.float32)

    w_p1 = params['W_phi1'].astype(compute_dtype)
    b_p1 = params['b_phi1'].astype(jnp.float32)
    w_p2 = params['W_phi2'].astype(compute_dtype)
    b_p2 = params['b_phi2'].astype(jnp.float32)
    w_r1 = params['W_rho1'].astype(compute_dtype)
    b_r1 = params['b_rho1'].astype(jnp.float32)
    w_r2 = params['W_rho2'].astype(compute_dtype)
    b_r2 = params['b_rho2'].astype(jnp.float32)

    bags_c = bags.astype(compute_dtype)

    tile_n = _pick_tile_n(N, max_tile_n)
    n_tiles = N // tile_n

    def full_spec(arr):
        nd = arr.ndim
        return pl.BlockSpec(arr.shape, lambda b, nt, _nd=nd: (0,) * _nd)

    in_specs = [
        pl.BlockSpec((1, tile_n, F), lambda b, nt: (b, nt, 0)),
        full_spec(w_enc), full_spec(b_enc),
        full_spec(w_p1), full_spec(b_p1),
        full_spec(w_p2), full_spec(b_p2),
        full_spec(w_r1), full_spec(b_r1),
        full_spec(w_r2), full_spec(b_r2),
    ]
    # 3-D output so the last two block dims are full-extent (clean store).
    out_spec = pl.BlockSpec((1, 1, n_out), lambda b, nt: (b, 0, 0))

    kernel = functools.partial(_deepset_mil_kernel, compute_dtype=compute_dtype)
    out = pl.pallas_call(
        kernel,
        out_shape=jax.ShapeDtypeStruct((B, 1, n_out), jnp.float32),
        grid_spec=pltpu.PrefetchScalarGridSpec(
            num_scalar_prefetch=0,
            grid=(B, n_tiles),
            in_specs=in_specs,
            out_specs=out_spec,
            scratch_shapes=[pltpu.VMEM((1, Z), jnp.float32)]),
        compiler_params=pltpu.CompilerParams(
            dimension_semantics=("parallel", "arbitrary")),
    )(bags_c, w_enc, b_enc, w_p1, b_p1, w_p2, b_p2, w_r1, b_r1, w_r2, b_r2)
    return out.reshape(B, n_out)


def init_params(key, n_feats, n_out, z_dim):
    """Xavier-normal weights, zero biases — mirrors initialize_weights().
    Linear weights are stored pre-transposed as (in_features, out_features)."""
    def xavier(k, fan_in, fan_out):
        std = math.sqrt(2.0 / (fan_in + fan_out))
        return std * jax.random.normal(k, (fan_in, fan_out), dtype=jnp.float32)

    ks = jax.random.split(key, 5)
    return {
        'W_enc': xavier(ks[0], n_feats, z_dim),
        'b_enc': jnp.zeros((1, z_dim), jnp.float32),
        'W_phi1': xavier(ks[1], z_dim, z_dim),
        'b_phi1': jnp.zeros((1, z_dim), jnp.float32),
        'W_phi2': xavier(ks[2], z_dim, z_dim),
        'b_phi2': jnp.zeros((1, z_dim), jnp.float32),
        'W_rho1': xavier(ks[3], z_dim, z_dim),
        'b_rho1': jnp.zeros((1, z_dim), jnp.float32),
        'W_rho2': xavier(ks[4], z_dim, n_out),
        'b_rho2': jnp.zeros((1, n_out), jnp.float32),
    }


def reference_forward(bags, params):
    """Pure-JAX reference (eval mode), straightforward module translation."""
    B, N, F = bags.shape
    x = bags.reshape(B * N, F)
    emb = jnp.maximum(x @ params['W_enc'] + params['b_enc'], 0.0)
    emb = emb / jnp.sqrt(1.0 + BN_EPS)      # BatchNorm1d eval with fresh stats
    h = jnp.maximum(emb @ params['W_phi1'] + params['b_phi1'], 0.0)
    phi = h @ params['W_phi2'] + params['b_phi2']
    pooled = phi.reshape(B, N, -1).sum(axis=1)
    r = jnp.maximum(pooled @ params['W_rho1'] + params['b_rho1'], 0.0)
    return r @ params['W_rho2'] + params['b_rho2']


if __name__ == "__main__":
    B, N, F = 2, 8, 32        # batch, patches per bag, input features
    Z, n_out = 32, 4          # latent dim, output classes

    key = jax.random.PRNGKey(0)
    k_bags, k_params = jax.random.split(key)
    bags = jax.random.normal(k_bags, (B, N, F), dtype=jnp.float32)
    params = init_params(k_params, F, n_out, Z)

    ref = reference_forward(bags, params)

    # f32 compute path: validates the kernel semantics (tolerance allows for
    # the BN-scale fold reordering and backend matmul-precision defaults).
    out_f32 = jax.block_until_ready(
        deepset_mil_forward(bags, params, compute_dtype=jnp.float32))
    assert out_f32.shape == (B, n_out)
    assert jnp.allclose(out_f32, ref, rtol=5e-3, atol=5e-3), (out_f32, ref)

    # bf16 compute path (MXU-native inputs, f32 accumulation): looser check.
    out_bf16 = jax.block_until_ready(
        deepset_mil_forward(bags, params, compute_dtype=jnp.bfloat16))
    assert out_bf16.shape == (B, n_out)
    assert jnp.allclose(out_bf16, ref, rtol=5e-2, atol=5e-2), (out_bf16, ref)

    print("KERNEL_OK")
</pallas_src>

<mosaic_0001>
module attributes {stable_mosaic.version = 11 : i64} {
  func.func @_deepset_mil_kernel(%arg0: i32, %arg1: i32, %arg2: memref<1x8x32xf32, #tpu.memory_space<vmem>>, %arg3: memref<32x32xf32, #tpu.memory_space<vmem>>, %arg4: memref<1x32xf32, #tpu.memory_space<vmem>>, %arg5: memref<32x32xf32, #tpu.memory_space<vmem>>, %arg6: memref<1x32xf32, #tpu.memory_space<vmem>>, %arg7: memref<32x32xf32, #tpu.memory_space<vmem>>, %arg8: memref<1x32xf32, #tpu.memory_space<vmem>>, %arg9: memref<32x32xf32, #tpu.memory_space<vmem>>, %arg10: memref<1x32xf32, #tpu.memory_space<vmem>>, %arg11: memref<32x4xf32, #tpu.memory_space<vmem>>, %arg12: memref<1x4xf32, #tpu.memory_space<vmem>>, %arg13: memref<1x1x4xf32, #tpu.memory_space<vmem>>, %arg14: memref<1x32xf32, #tpu.memory_space<vmem>>) attributes {dimension_semantics = [#tpu.dimension_semantics<parallel>, #tpu.dimension_semantics<arbitrary>], iteration_bounds = array<i64: 2, 1>, scalar_prefetch = 0 : i64, scratch_operands = 1 : i64, tpu.core_type = #tpu.core_type<tc>, window_params = [{transform_indices = @transform_0, window_bounds = array<i64: 1, 8, 32>}, {pipeline_mode = #tpu.pipeline_mode<synchronous>, transform_indices = @transform_1, window_bounds = array<i64: 32, 32>}, {pipeline_mode = #tpu.pipeline_mode<synchronous>, transform_indices = @transform_2, window_bounds = array<i64: 1, 32>}, {pipeline_mode = #tpu.pipeline_mode<synchronous>, transform_indices = @transform_3, window_bounds = array<i64: 32, 32>}, {pipeline_mode = #tpu.pipeline_mode<synchronous>, transform_indices = @transform_4, window_bounds = array<i64: 1, 32>}, {pipeline_mode = #tpu.pipeline_mode<synchronous>, transform_indices = @transform_5, window_bounds = array<i64: 32, 32>}, {pipeline_mode = #tpu.pipeline_mode<synchronous>, transform_indices = @transform_6, window_bounds = array<i64: 1, 32>}, {pipeline_mode = #tpu.pipeline_mode<synchronous>, transform_indices = @transform_7, window_bounds = array<i64: 32, 32>}, {pipeline_mode = #tpu.pipeline_mode<synchronous>, transform_indices = @transform_8, window_bounds = array<i64: 1, 32>}, {pipeline_mode = #tpu.pipeline_mode<synchronous>, transform_indices = @transform_9, window_bounds = array<i64: 32, 4>}, {pipeline_mode = #tpu.pipeline_mode<synchronous>, transform_indices = @transform_10, window_bounds = array<i64: 1, 4>}, {transform_indices = @transform_11, window_bounds = array<i64: 1, 1, 4>}]} {
    %c0 = arith.constant 0 : index
    %c0_0 = arith.constant 0 : index
    %c0_1 = arith.constant 0 : index
    %0 = vector.load %arg2[%c0, %c0_0, %c0_1] : memref<1x8x32xf32, #tpu.memory_space<vmem>>, vector<1x8x32xf32>
    %1 = vector.shape_cast %0 : vector<1x8x32xf32> to vector<8x32xf32>
    %c0_2 = arith.constant 0 : index
    %c0_3 = arith.constant 0 : index
    %2 = vector.load %arg3[%c0_2, %c0_3] : memref<32x32xf32, #tpu.memory_space<vmem>>, vector<32x32xf32>
    %cst = arith.constant dense<0.000000e+00> : vector<8x32xf32>
    %3 = tpu.matmul %1, %2, %cst {dimension_numbers = #tpu.dot_dimension_numbers<[1], [0], [0], [1], [0, 0, 1, 1], [], []>} : vector<8x32xf32>, vector<32x32xf32>, vector<8x32xf32> -> vector<8x32xf32>
    %c0_4 = arith.constant 0 : index
    %c0_5 = arith.constant 0 : index
    %4 = vector.load %arg4[%c0_4, %c0_5] : memref<1x32xf32, #tpu.memory_space<vmem>>, vector<1x32xf32>
    %5 = vector.broadcast %4 : vector<1x32xf32> to vector<8x32xf32>
    %6 = arith.addf %3, %5 : vector<8x32xf32>
    %cst_6 = arith.constant 0.000000e+00 : f32
    %7 = vector.broadcast %cst_6 : f32 to vector<8x32xf32>
    %8 = arith.maximumf %6, %7 : vector<8x32xf32>
    %c0_7 = arith.constant 0 : index
    %c0_8 = arith.constant 0 : index
    %9 = vector.load %arg5[%c0_7, %c0_8] : memref<32x32xf32, #tpu.memory_space<vmem>>, vector<32x32xf32>
    %cst_9 = arith.constant dense<0.000000e+00> : vector<8x32xf32>
    %10 = tpu.matmul %8, %9, %cst_9 {dimension_numbers = #tpu.dot_dimension_numbers<[1], [0], [0], [1], [0, 0, 1, 1], [], []>} : vector<8x32xf32>, vector<32x32xf32>, vector<8x32xf32> -> vector<8x32xf32>
    %c0_10 = arith.constant 0 : index
    %c0_11 = arith.constant 0 : index
    %11 = vector.load %arg6[%c0_10, %c0_11] : memref<1x32xf32, #tpu.memory_space<vmem>>, vector<1x32xf32>
    %12 = vector.broadcast %11 : vector<1x32xf32> to vector<8x32xf32>
    %13 = arith.addf %10, %12 : vector<8x32xf32>
    %cst_12 = arith.constant 0.000000e+00 : f32
    %14 = vector.broadcast %cst_12 : f32 to vector<8x32xf32>
    %15 = arith.maximumf %13, %14 : vector<8x32xf32>
    %c0_13 = arith.constant 0 : index
    %c0_14 = arith.constant 0 : index
    %16 = vector.load %arg7[%c0_13, %c0_14] : memref<32x32xf32, #tpu.memory_space<vmem>>, vector<32x32xf32>
    %cst_15 = arith.constant dense<0.000000e+00> : vector<8x32xf32>
    %17 = tpu.matmul %15, %16, %cst_15 {dimension_numbers = #tpu.dot_dimension_numbers<[1], [0], [0], [1], [0, 0, 1, 1], [], []>} : vector<8x32xf32>, vector<32x32xf32>, vector<8x32xf32> -> vector<8x32xf32>
    %c0_16 = arith.constant 0 : index
    %c0_17 = arith.constant 0 : index
    %18 = vector.load %arg8[%c0_16, %c0_17] : memref<1x32xf32, #tpu.memory_space<vmem>>, vector<1x32xf32>
    %19 = vector.broadcast %18 : vector<1x32xf32> to vector<8x32xf32>
    %20 = arith.addf %17, %19 : vector<8x32xf32>
    %cst_18 = arith.constant dense<0.000000e+00> : vector<32xf32>
    %21 = vector.multi_reduction <add>, %20, %cst_18 [0] : vector<8x32xf32> to vector<32xf32>
    %22 = vector.shape_cast %21 : vector<32xf32> to vector<1x32xf32>
    %c0_i32 = arith.constant 0 : i32
    %23 = arith.cmpi eq, %arg1, %c0_i32 : i32
    %24 = arith.extui %23 : i1 to i32
    %c0_i32_19 = arith.constant 0 : i32
    %25 = arith.cmpi ne, %24, %c0_i32_19 : i32
    scf.if %25 {
      %cst_26 = arith.constant 0.000000e+00 : f32
      %32 = vector.broadcast %cst_26 : f32 to vector<1x32xf32>
      %c0_27 = arith.constant 0 : index
      %c0_28 = arith.constant 0 : index
      %33 = vector.load %arg14[%c0_27, %c0_28] : memref<1x32xf32, #tpu.memory_space<vmem>>, vector<1x32xf32>
      tpu.vector_store %arg14[%c0_27, %c0_28], %32 {strides = array<i32>} : memref<1x32xf32, #tpu.memory_space<vmem>>, vector<1x32xf32>,
    } else {
    }
    %c0_20 = arith.constant 0 : index
    %c0_21 = arith.constant 0 : index
    %26 = vector.load %arg14[%c0_20, %c0_21] : memref<1x32xf32, #tpu.memory_space<vmem>>, vector<1x32xf32>
    %27 = arith.addf %26, %22 : vector<1x32xf32>
    %c0_22 = arith.constant 0 : index
    %c0_23 = arith.constant 0 : index
    %28 = vector.load %arg14[%c0_22, %c0_23] : memref<1x32xf32, #tpu.memory_space<vmem>>, vector<1x32xf32>
    tpu.vector_store %arg14[%c0_22, %c0_23], %27 {strides = array<i32>} : memref<1x32xf32, #tpu.memory_space<vmem>>, vector<1x32xf32>,
    %c0_i32_24 = arith.constant 0 : i32
    %29 = arith.cmpi eq, %arg1, %c0_i32_24 : i32
    %30 = arith.extui %29 : i1 to i32
    %c0_i32_25 = arith.constant 0 : i32
    %31 = arith.cmpi ne, %30, %c0_i32_25 : i32
    scf.if %31 {
      %c0_26 = arith.constant 0 : index
      %c0_27 = arith.constant 0 : index
      %32 = vector.load %arg14[%c0_26, %c0_27] : memref<1x32xf32, #tpu.memory_space<vmem>>, vector<1x32xf32>
      %c0_28 = arith.constant 0 : index
      %c0_29 = arith.constant 0 : index
      %33 = vector.load %arg9[%c0_28, %c0_29] : memref<32x32xf32, #tpu.memory_space<vmem>>, vector<32x32xf32>
      %cst_30 = arith.constant dense<0.000000e+00> : vector<1x32xf32>
      %34 = tpu.matmul %32, %33, %cst_30 {dimension_numbers = #tpu.dot_dimension_numbers<[1], [0], [0], [1], [0, 0, 1, 1], [], []>} : vector<1x32xf32>, vector<32x32xf32>, vector<1x32xf32> -> vector<1x32xf32>
      %c0_31 = arith.constant 0 : index
      %c0_32 = arith.constant 0 : index
      %35 = vector.load %arg10[%c0_31, %c0_32] : memref<1x32xf32, #tpu.memory_space<vmem>>, vector<1x32xf32>
      %36 = arith.addf %34, %35 : vector<1x32xf32>
      %cst_33 = arith.constant 0.000000e+00 : f32
      %37 = vector.broadcast %cst_33 : f32 to vector<1x32xf32>
      %38 = arith.maximumf %36, %37 : vector<1x32xf32>
      %c0_34 = arith.constant 0 : index
      %c0_35 = arith.constant 0 : index
      %39 = vector.load %arg11[%c0_34, %c0_35] : memref<32x4xf32, #tpu.memory_space<vmem>>, vector<32x4xf32>
      %cst_36 = arith.constant dense<0.000000e+00> : vector<1x4xf32>
      %40 = tpu.matmul %38, %39, %cst_36 {dimension_numbers = #tpu.dot_dimension_numbers<[1], [0], [0], [1], [0, 0, 1, 1], [], []>} : vector<1x32xf32>, vector<32x4xf32>, vector<1x4xf32> -> vector<1x4xf32>
      %c0_37 = arith.constant 0 : index
      %c0_38 = arith.constant 0 : index
      %41 = vector.load %arg12[%c0_37, %c0_38] : memref<1x4xf32, #tpu.memory_space<vmem>>, vector<1x4xf32>
      %42 = arith.addf %40, %41 : vector<1x4xf32>
      %43 = vector.shape_cast %42 : vector<1x4xf32> to vector<1x1x4xf32>
      %c0_39 = arith.constant 0 : index
      %c0_40 = arith.constant 0 : index
      %c0_41 = arith.constant 0 : index
      %44 = vector.load %arg13[%c0_39, %c0_40, %c0_41] : memref<1x1x4xf32, #tpu.memory_space<vmem>>, vector<1x1x4xf32>
      tpu.vector_store %arg13[%c0_39, %c0_40, %c0_41], %43 {strides = array<i32>} : memref<1x1x4xf32, #tpu.memory_space<vmem>>, vector<1x1x4xf32>,
    } else {
    }
    return
  }
  func.func @transform_0(%arg0: i32, %arg1: i32) -> (i32, i32, i32) {
    %c0_i32 = arith.constant 0 : i32
    %c0_i32_0 = arith.constant 0 : i32
    return %arg0, %arg1, %c0_i32 : i32, i32, i32
  }
  func.func @transform_1(%arg0: i32, %arg1: i32) -> (i32, i32) {
    %c0_i32 = arith.constant 0 : i32
    %c0_i32_0 = arith.constant 0 : i32
    %c0_i32_1 = arith.constant 0 : i32
    return %c0_i32, %c0_i32_0 : i32, i32
  }
  func.func @transform_2(%arg0: i32, %arg1: i32) -> (i32, i32) {
    %c0_i32 = arith.constant 0 : i32
    %c0_i32_0 = arith.constant 0 : i32
    %c0_i32_1 = arith.constant 0 : i32
    return %c0_i32, %c0_i32_0 : i32, i32
  }
  func.func @transform_3(%arg0: i32, %arg1: i32) -> (i32, i32) {
    %c0_i32 = arith.constant 0 : i32
    %c0_i32_0 = arith.constant 0 : i32
    %c0_i32_1 = arith.constant 0 : i32
    return %c0_i32, %c0_i32_0 : i32, i32
  }
  func.func @transform_4(%arg0: i32, %arg1: i32) -> (i32, i32) {
    %c0_i32 = arith.constant 0 : i32
    %c0_i32_0 = arith.constant 0 : i32
    %c0_i32_1 = arith.constant 0 : i32
    return %c0_i32, %c0_i32_0 : i32, i32
  }
  func.func @transform_5(%arg0: i32, %arg1: i32) -> (i32, i32) {
    %c0_i32 = arith.constant 0 : i32
    %c0_i32_0 = arith.constant 0 : i32
    %c0_i32_1 = arith.constant 0 : i32
    return %c0_i32, %c0_i32_0 : i32, i32
  }
  func.func @transform_6(%arg0: i32, %arg1: i32) -> (i32, i32) {
    %c0_i32 = arith.constant 0 : i32
    %c0_i32_0 = arith.constant 0 : i32
    %c0_i32_1 = arith.constant 0 : i32
    return %c0_i32, %c0_i32_0 : i32, i32
  }
  func.func @transform_7(%arg0: i32, %arg1: i32) -> (i32, i32) {
    %c0_i32 = arith.constant 0 : i32
    %c0_i32_0 = arith.constant 0 : i32
    %c0_i32_1 = arith.constant 0 : i32
    return %c0_i32, %c0_i32_0 : i32, i32
  }
  func.func @transform_8(%arg0: i32, %arg1: i32) -> (i32, i32) {
    %c0_i32 = arith.constant 0 : i32
    %c0_i32_0 = arith.constant 0 : i32
    %c0_i32_1 = arith.constant 0 : i32
    return %c0_i32, %c0_i32_0 : i32, i32
  }
  func.func @transform_9(%arg0: i32, %arg1: i32) -> (i32, i32) {
    %c0_i32 = arith.constant 0 : i32
    %c0_i32_0 = arith.constant 0 : i32
    %c0_i32_1 = arith.constant 0 : i32
    return %c0_i32, %c0_i32_0 : i32, i32
  }
  func.func @transform_10(%arg0: i32, %arg1: i32) -> (i32, i32) {
    %c0_i32 = arith.constant 0 : i32
    %c0_i32_0 = arith.constant 0 : i32
    %c0_i32_1 = arith.constant 0 : i32
    return %c0_i32, %c0_i32_0 : i32, i32
  }
  func.func @transform_11(%arg0: i32, %arg1: i32) -> (i32, i32, i32) {
    %c0_i32 = arith.constant 0 : i32
    %c0_i32_0 = arith.constant 0 : i32
    %c0_i32_1 = arith.constant 0 : i32
    return %arg0, %c0_i32, %c0_i32_0 : i32, i32, i32
  }
}

</mosaic_0001>

<bundles_post_ra>
// kernel: tpu_custom_call.1
= control target key start
LH: loop header
LB: loop body
LE: loop exit
PB: predicated region body
PF: predicated region fallthrough
CT: control target
= control target key end

     0   :  { %s1751_s0 = inlined_call_operand.hbm [shape: f32[2,8,32], index: 0, kind: input, shape index: {}]   ;;  %s1752_s1 = inlined_call_operand.vmem [shape: f32[32,32], index: 1, kind: input, shape index: {}]   ;;  %s1753_s2 = inlined_call_operand.vmem [shape: f32[1,32], index: 2, kind: input, shape index: {}]   ;;  %s1754_s3 = inlined_call_operand.hbm [shape: f32[32,32], index: 3, kind: input, shape index: {}]   ;;  %s1755_s4 = inlined_call_operand.vmem [shape: f32[1,32], index: 4, kind: input, shape index: {}]   ;;  %s1756_s5 = inlined_call_operand.hbm [shape: f32[32,32], index: 5, kind: input, shape index: {}]   ;;  %s1757_s6 = inlined_call_operand.vmem [shape: f32[1,32], index: 6, kind: input, shape index: {}]   ;;  %s1758_s7 = inlined_call_operand.hbm [shape: f32[32,32], index: 7, kind: input, shape index: {}]   ;;  %s1759_s8 = inlined_call_operand.vmem [shape: f32[1,32], index: 8, kind: input, shape index: {}]   ;;  %s1760_s9 = inlined_call_operand.vmem [shape: f32[32,4], index: 9, kind: input, shape index: {}]   ;;  %s1761_s10 = inlined_call_operand.vmem [shape: f32[1,4], index: 10, kind: input, shape index: {}]   ;;  %s1762_s11 = inlined_call_operand.hbm [shape: f32[2,1,4], index: 11, kind: output, shape index: {}]  }
   0x1   :  { %1771 = sst [smem:[#allocation19_spill]] %s1754_s3 }
   0x2   :  { %1772 = sst [smem:[#allocation20_spill]] %s1756_s5 }
   0x3   :  { %1773 = sst [smem:[#allocation21_spill]] %s1758_s7 }
   0x4   :  { %1774 = sst [smem:[#allocation22_spill]] %s1762_s11 }
   0x5   :  { %16 = vsyncpa [#allocation4], 0 }
   0x6   :  { %18 = vsyncpa [#allocation4 + $0x1], 0 }
   0x7   :  { %19 = vsyncpa [#allocation7], 0 }
   0x8   :  { %20 = vsyncpa [#allocation10], 0 }
   0x9   :  { %21 = vsyncpa [#allocation5], 0 }
   0xa   :  { %23 = vsyncpa [#allocation5 + $0x1], 0  ;;  %s1480_s17 = smov 0   ;;  %s1482_s18 = smov 0  }
   0xb   :  { %s1484_s19 = smov 0   ;;  %s1486_s20 = smov 0  }
   0xc   :  { %s1488_s21 = smov 0   ;;  %s1490_s22 = smov 0  }
   0xd LB: > { %1775 = sst [smem:[#allocation16_spill]] %s1389_s17  ;;  %s1013_s23 = sadd.s32 4294967295, %s1409_s22   ;;  %s1409_s22 = sphi %s1490_s22, %s29_s22   ;;  %s1405_s21 = sphi %s1488_s21, %s1802_s21   ;;  %s1401_s20 = sphi %s1486_s20, %s1801_s20   ;;  %s1397_s19 = sphi %s1484_s19, %s1800_s19   ;;  %s1393_s18 = sphi %s1482_s18, %s1799_s18   ;;  %s1389_s17 = sphi %s1480_s17, %s1798_s17  }
   0xe   : > { %s1014_s24 = sadd.s32 4294967294, %s1409_s22   ;;  %p63_p0 = scmp.ne.s32.totalorder %s1393_s18, %s1389_s17 }
   0xf   : > { %p1514_p1 = scmp.eq.s32.totalorder %s1013_s23, 0  ;;  %p1518_p2 = scmp.eq.s32.totalorder %s1013_s23, 1 }
  0x10   : > { %p303_p3 = scmp.eq.s32.totalorder %s1014_s24, 1  ;;  %p1015_p5 = scmp.ge.s32.totalorder %s1409_s22, 1 }
  0x11   : > { %s1776_s25 = scalar_select %p1514_p1, 1, 0 }
  0x12   : > { %p1524_p4 = por %p1514_p1, %p63_p0  ;;  %p1529_p6 = por %p303_p3, %p63_p0 }
  0x13   : > { %p310_p7 = scmp.lt.s32.totalorder %s1409_s22, 3  ;;  %s1411_s30 = smov [#allocation6]  }
  0x14   : > { %s1778_s27 = scalar_select %p1524_p4, 1, 0 }
  0x15   : > { %s1779_s28 = scalar_select %p1529_p6, 1, 0 }
  0x16   : > { %p1534_p8 = pnand %p1015_p5, %p310_p7  ;;  %s328_s12 = sshll.u32 %s1411_s30, 4  ;;  %s329_s12 = int_to_ptr.vmem [resolvable:$true] %s328_s12 }
  0x17   : > { %1780 = sst [smem:[#allocation17_spill]] %s1779_s28  ;;  %s1412_s14 = smov [#allocation8]  }
  0x18   : > { %s1781_s29 = scalar_select %p1534_p8, 1, 0 }
  0x19   : > { %p1134_p9 = pneg %p1534_p8  ;;  %s344_s15 = sshll.u32 %s1412_s14, 4  ;;  %s345_s15 = int_to_ptr.vmem [resolvable:$true] %s344_s15 }
  0x1a   : > { %s1413_s16 = smov [#allocation9]   ;;  %s1226_s24 = scalar_lea.vmem %s329_s12, 512 }
  0x1b   : > { %p1543_p11 = pnand %p1134_p9, %p1514_p1  ;;  %s360_s23 = sshll.u32 %s1413_s16, 4  ;;  %s361_s23 = int_to_ptr.vmem [resolvable:$true] %s360_s23 }
  0x1c   : > { %p1227_p13 = scmp.ne.s32.totalorder %s329_s12, %s1226_s24  ;;  %p1234_p5 = scmp.lt.s32.totalorder %s329_s12, %s329_s12 }
  0x1d   : > { %p1217_p12 = pneg %p1543_p11  ;;  %p1235_p7 = scmp.lt.s32.totalorder %s1226_s24, %s1226_s24 }
  0x1f   : > { %p1229_p0 = pnand %p1227_p13, %p1217_p12  ;;  %p1236_p9 = por %p1235_p7, %p1234_p5 }
  0x21   : > { %p1230_p3 = pneg %p1229_p0 }
  0x23   : > { %p1237_p10 = pnand %p1236_p9, %p1230_p3 }
  0x25   : > { %1240 = shalt.err (!%p1237_p10)
}
  0x26   : > { %s1414_s30 = smov 128   ;;  %s1415_s14 = smov 8  }
  0x27   : > { %s1783_s3 = sld [smem:[#allocation19_spill]]  ;;  %s1252_s17 = scalar_lea.vmem %s345_s15, 512 }
  0x28   : > { %p1253_p6 = scmp.ne.s32.totalorder %s345_s15, %s1252_s17  ;;  %p1260_p1 = scmp.lt.s32.totalorder %s345_s15, %s345_s15 }
  0x29   : > { %p1261_p4 = scmp.lt.s32.totalorder %s1252_s17, %s1252_s17 }
  0x2a   : > { %p1255_p13 = pnand %p1253_p6, %p1217_p12 }
  0x2b   : > { %p1262_p5 = por %p1261_p4, %p1260_p1 }
  0x2c   : > { %p1256_p0 = pneg %p1255_p13 }
  0x2d   : > { %1137 = dma.hbm_to_vmem [thread:$0]  (!%p1543_p11), %s1783_s3, 512, %s329_s12, [#allocation7], %s1414_s30, %s1414_s30, %s1415_s14  }
  0x2e   : > { %p1263_p3 = pnand %p1262_p5, %p1256_p0 }
  0x30   : > { %1266 = shalt.err (!%p1263_p3)
}
  0x31   : > { %s1784_s5 = sld [smem:[#allocation20_spill]]  ;;  %s1278_s28 = scalar_lea.vmem %s361_s23, 512 }
  0x32   : > { %p1279_p10 = scmp.ne.s32.totalorder %s361_s23, %s1278_s28  ;;  %p1286_p9 = scmp.lt.s32.totalorder %s361_s23, %s361_s23 }
  0x33   : > { %p1287_p13 = scmp.lt.s32.totalorder %s1278_s28, %s1278_s28 }
  0x34   : > { %p1281_p7 = pnand %p1279_p10, %p1217_p12 }
  0x35   : > { %p1288_p8 = por %p1287_p13, %p1286_p9 }
  0x36   : > { %p1282_p6 = pneg %p1281_p7 }
  0x37   : > { %1140 = dma.hbm_to_vmem [thread:$0]  (!%p1543_p11), %s1784_s5, 512, %s345_s15, [#allocation7], %s1414_s30, %s1414_s30, %s1415_s14  }
  0x38   : > { %p1289_p1 = pnand %p1288_p8, %p1282_p6 }
  0x3a   : > { %1292 = shalt.err (!%p1289_p1)
}
  0x3b   : > { %s1785_s7 = sld [smem:[#allocation21_spill]]  ;;  %s50_s11 = sadd.s32 1, %s1397_s19 }
  0x3c   : > { %s41_s15 = sadd.s32 1, %s1405_s21  ;;  %p57_p4 = scmp.ne.s32.totalorder %s1397_s19, %s1393_s18 }
  0x3d   : > { %p43_p8 = scmp.ge.s32.totalorder %s41_s15, 2  ;;  %p58_p12 = scmp.eq.s32.totalorder %s1409_s22, 0 }
  0x3e   : > { %p1580_p0 = por %p1518_p2, %p57_p4  ;;  %p1155_p5 = scmp.lt.s32.totalorder %s1409_s22, 2 }
  0x3f   : > { %s1804_s15 = smov (%p43_p8, %s41_s15), 0  ;;  %p59_p3 = por %p58_p12, %p57_p4 }
  0x40   : > { %1787 = sst [smem:[#allocation18_spill]] %s1804_s15  ;;  %s383_s16 = sand.u32 1, %s1397_s19  }
  0x41   : > { %1143 = dma.hbm_to_vmem [thread:$0]  (!%p1543_p11), %s1785_s7, 512, %s361_s23, [#allocation10], %s1414_s30, %s1414_s30, %s1415_s14  }
  0x42   : > { %s45_s24 = ssub.s32 %s1405_s21, %s1804_s15  ;;  %s1020_s23 = sshll.u32 %s383_s16, 3 }
  0x43   : > { %p48_p10 = scmp.eq.s32.totalorder %s45_s24, 0  ;;  %s1021_s30 = sshll.u32 %s1405_s21, 7 }
  0x44   : > { %s393_s26 = scalar_lea.hbm %s1751_s0, %s1021_s30  ;;  %s387_s12 = scalar_lea.vmem [#allocation3], %s1020_s23 }
  0x45   : > { %s1592_s14 = scalar_select %p48_p10, %s1397_s19, %s50_s11  }
  0x46   : > { %s395_s3 = sshll.u32 %s387_s12, 4  ;;  %p1599_p2 = pnand %p1155_p5, %p59_p3  ;;  %s396_s3 = int_to_ptr.vmem [resolvable:$true] %s395_s3 }
  0x47   : > { %s384_s7 = scalar_lea.sflag [#allocation4], %s383_s16  ;;  %s1306_s24 = scalar_lea.vmem %s396_s3, 128 }
  0x48   : > { %p1295_p11 = pneg %p1599_p2  ;;  %p1307_p7 = scmp.ne.s32.totalorder %s396_s3, %s1306_s24 }
  0x49   : > { %s1416_s11 = smov [#allocation3]  }
  0x4a   : > { %p1309_p6 = pnand %p1307_p7, %p1295_p11  ;;  %s1311_s15 = sshll.u32 %s1416_s11, 4  ;;  %s1312_s15 = int_to_ptr.vmem [resolvable:$false] %s1311_s15 }
  0x4b   : > { %s1313_s30 = scalar_lea.vmem %s1312_s15, 256  ;;  %p1314_p13 = scmp.lt.s32.totalorder %s396_s3, %s1312_s15 }
  0x4c   : > { %p1310_p9 = pneg %p1309_p6  ;;  %p1315_p1 = scmp.lt.s32.totalorder %s1313_s30, %s1306_s24 }
  0x4e   : > { %p1316_p4 = por %p1315_p1, %p1314_p13 }
  0x50   : > { %p1317_p8 = pnand %p1316_p4, %p1310_p9 }
  0x52   : > { %1320 = shalt.err (!%p1317_p8)
}
  0x53   : > { %1147 = dma.hbm_to_vmem [thread:$0]  (!%p1599_p2), %s393_s26, 128, %s396_s3, %s384_s7  }
  0x54   : > { %p1789_p12 = scmp.ne.s32.totalorder %s1781_s29, 0 }
  0x55   : > { %s1610_s16 = sand.u32 (!%p1789_p12), 1, %s1393_s18   ;;  %p1790_p5 = scmp.ne.s32.totalorder (!%p1789_p12), %s1778_s27, 0 }
  0x56   : > { %404 = sbr.rel (%p1789_p12) target bundleno = 1124 (0x464), region = 64  ;;  %s1023_s23 = sshll.u32 (!%p1789_p12), %s1610_s16, 3 }
  0x57   : > { %s407_s28 = scalar_lea.sflag (!%p1789_p12), [#allocation4], %s1610_s16  ;;  %s410_s17 = scalar_lea.vmem (!%p1789_p12), [#allocation3], %s1023_s23 }
  0x5b   : > { %1372 = dma.done.wait (%p1790_p5), %s407_s28, 128  }
  0x5c   : > { %1374 = vsyncadd (%p1790_p5), %s407_s28, 4294967168  ;;  %p1791_p3 = scmp.ne.s32.totalorder %s1776_s25, 0 }
  0x5e   : > { %1376 = dma.done.wait (%p1791_p3), [#allocation7], 1024  }
  0x5f   : > { %1378 = vsyncadd (%p1791_p3), [#allocation7], 4294966272 }
  0x60   : > { %1380 = dma.done.wait (%p1791_p3), [#allocation10], 512  }
  0x61   : > { %1382 = vsyncadd (%p1791_p3), [#allocation10], 4294966784  ;;  %v1417_v0 = vmov 0.0   ;;  %vm1418_vm0 = vmmov 0   ;;  %v464_v1 = vld [vmem:[%s1752_s1 + $0x18] sm:$0xff]  ;;  %v463_v2 = vld [vmem:[%s1752_s1 + $0x10] sm:$0xff] }
  0x62   : > { %1063 = vmatprep.subr.mxu0 %v1417_v0  ;;  %1071 = vmatprep.mubr.msk.f32.mxu0 %vm1418_vm0, %v1417_v0  ;;  %v550_v3 = vld [vmem:[#allocation6 + $0x18] sm:$0xff]  ;;  %v461_v5 = vld [vmem:[%s1752_s1] sm:$0xff]  ;;  %vm472_vm1 = vcmask 261120   ;;  %v547_v9 = vld [vmem:[#allocation6] sm:$0xff]  ;;  %vm727_vm2 = vcmask 253952   ;;  %s1035_s30 = sshll.u32 %s1401_s20, 4 }
  0x63   : > { %1074 = vmatprep.subr.mxu1 %v1417_v0  ;;  %1082 = vmatprep.mubr.msk.f32.mxu1 %vm1418_vm0, %v1417_v0  ;;  %v462_v4 = vld [vmem:[%s1752_s1 + $0x8] sm:$0xff]  ;;  %v548_v8 = vld [vmem:[#allocation6 + $0x8] sm:$0xff]  ;;  %v632_v18 = vld [vmem:[#allocation8] sm:$0xff]  ;;  %728 = vst.msk [vmem:[#allocation2] sm:$0x1] %vm727_vm2, %v1417_v0  ;;  %s459_s23 = scalar_lea.vmem [#allocation11], %s1610_s16 }
  0x64   : > { %1064 = vmatpush3.msra.mxu0 %v464_v1  ;;  %1075 = vmatpush3.msra.mxu1 %v550_v3  ;;  %v460_v6 = vld [vmem:[%s410_s17] sm:$0xff]  ;;  %v1027_v11 = vld [vmem:[%s1753_s2] ss:$0 sm:$0xff]  ;;  %v737_v27 = vld [vmem:[#allocation9] sm:$0xff]  ;;  %s909_s28 = sshll.u32 %s459_s23, 4  ;;  %vm894_vm3 = vcmask 24576   ;;  %s910_s28 = int_to_ptr.vmem [resolvable:$true] %s909_s28 }
  0x65   : > { %1065 = vmatprep.subr.mxu0 %v1417_v0  ;;  %1076 = vmatprep.subr.mxu1 %v1417_v0  ;;  %v549_v7 = vld [vmem:[#allocation6 + $0x10] sm:$0xff]  ;;  %v635_v10 = vld [vmem:[#allocation8 + $0x18] sm:$0xff]  ;;  %v633_v17 = vld [vmem:[#allocation8 + $0x8] sm:$0xff]  ;;  %s1792_s5 = sld [smem:[#allocation22_spill]]  ;;  %s897_s27 = scalar_lea.sflag [#allocation5], %s1610_s16 }
  0x66   : > { %1066 = vmatpush3.msra.mxu0 %v463_v2  ;;  %1077 = vmatpush3.msra.mxu1 %v549_v7  ;;  %v634_v16 = vld [vmem:[#allocation8 + $0x10] sm:$0xff]  ;;  %v1029_v19 = vld [vmem:[%s1755_s4] ss:$0 sm:$0xff]  ;;  %v740_v24 = vld [vmem:[#allocation9 + $0x18] sm:$0xff]  ;;  %s1321_s25 = scalar_lea.vmem %s910_s28, 16  ;;  %s1419_s20 = smov [#allocation11]  }
  0x67   : > { %1067 = vmatprep.subr.mxu0 %v1417_v0  ;;  %1078 = vmatprep.subr.mxu1 %v1417_v0  ;;  %v739_v25 = vld [vmem:[#allocation9 + $0x10] sm:$0xff]  ;;  %v738_v26 = vld [vmem:[#allocation9 + $0x8] sm:$0xff]  ;;  %v818_v43 = vld [vmem:[%s1760_s9 + $0x10] sm:$0xff]  ;;  %p1322_p10 = scmp.ne.s32.totalorder %s910_s28, %s1321_s25  ;;  %s1325_s29 = sshll.u32 %s1419_s20, 4  ;;  %s1326_s29 = int_to_ptr.vmem [resolvable:$false] %s1325_s29 }
  0x68   : > { %1068 = vmatpush3.msra.mxu0 %v462_v4  ;;  %1079 = vmatpush3.msra.mxu1 %v548_v8  ;;  %v819_v28 = vld [vmem:[%s1760_s9 + $0x18] sm:$0xff]  ;;  %v1031_v29 = vld [vmem:[%s1757_s6] ss:$0 sm:$0xff]  ;;  %v817_v44 = vld [vmem:[%s1760_s9 + $0x8] sm:$0xff]  ;;  %s1327_s15 = scalar_lea.vmem %s1326_s29, 32  ;;  %p1328_p7 = scmp.lt.s32.totalorder %s910_s28, %s1326_s29 }
  0x69   : > { %1069 = vmatprep.subr.mxu0 %v1417_v0  ;;  %1080 = vmatprep.subr.mxu1 %v1417_v0  ;;  %v816_v45 = vld [vmem:[%s1760_s9] sm:$0xff]  ;;  %p1323_p2 = pnand %p1322_p10, %p1580_p0  ;;  %p1329_p6 = scmp.lt.s32.totalorder %s1327_s15, %s1321_s25 }
  0x6a   : > { %1070 = vmatpush3.msra.mxu0 %v461_v5  ;;  %1081 = vmatpush3.msra.mxu1 %v547_v9  ;;  %v729_v39 = vld [vmem:[#allocation2] sm:$0x1] }
  0x6b   : > { %1072 = vmatmul.mubr.msk.f32.vlgmr.msra.gmra.mxu0 %vm472_vm1, %v460_v6  ;;  %1085 = vmatprep.subr.mxu0 %v1417_v0  ;;  %v741_v46 = vld [vmem:[%s1759_s8] sm:$0x1]  ;;  %s1709_s7 = scalar_lea.hbm %s1792_s5, %s1035_s30  ;;  %p1324_p11 = pneg %p1323_p2 }
  0x6c   : > { %1093 = vmatprep.mubr.msk.f32.mxu0 %vm1418_vm0, %v1417_v0  ;;  %1096 = vmatprep.subr.mxu1 %v1417_v0  ;;  %v820_v51 = vld [vmem:[%s1761_s10] sm:$0x1]  ;;  %p1330_p9 = por %p1329_p6, %p1328_p7 }
  0x6d   : > { %1086 = vmatpush3.msra.mxu0 %v635_v10 }
  0x6e   : > { %1087 = vmatprep.subr.mxu0 %v1417_v0  ;;  %p1331_p13 = pnand %p1330_p9, %p1324_p11 }
  0x6f   : > { %1088 = vmatpush3.msra.mxu0 %v634_v16 }
  0x70   : > { %1089 = vmatprep.subr.mxu0 %v1417_v0 }
  0x71   : > { %1090 = vmatpush3.msra.mxu0 %v633_v17 }
  0x72   : > { %1091 = vmatprep.subr.mxu0 %v1417_v0 }
  0x73   : > { %1092 = vmatpush3.msra.mxu0 %v632_v18 }
  0x74   : > { %1107 = vmatprep.subr.mxu0 %v1417_v0 }
 0x12b   : > { %v542_v12 = vpop.f32.mrf.mxu0 }
 0x12c   : > { %v543_v13 = vadd.f32 %v1027_v11, %v542_v12 }
 0x12d   : > { %v1073_v14 = vpop.f32.mrf.mxu0 }
 0x12e   : > { %v546_v15 = vmax.f32 %v543_v13, 0.0 }
 0x130   : > { %1083 = vmatmul.mubr.msk.f32.vlgmr.msra.gmra.mxu1 %vm472_vm1, %v546_v15 }
 0x131   : > { %1104 = vmatprep.mubr.msk.f32.mxu1 %vm1418_vm0, %v1417_v0  ;;  %1097 = vmatpush3.msra.mxu1 %v740_v24 }
 0x132   : > { %1098 = vmatprep.subr.mxu1 %v1417_v0 }
 0x133   : > { %1099 = vmatpush3.msra.mxu1 %v739_v25 }
 0x134   : > { %1100 = vmatprep.subr.mxu1 %v1417_v0 }
 0x135   : > { %1101 = vmatpush3.msra.mxu1 %v738_v26 }
 0x136   : > { %1102 = vmatprep.subr.mxu1 %v1417_v0 }
 0x137   : > { %1103 = vmatpush3.msra.mxu1 %v737_v27 }
 0x1f0   : > { %v627_v20 = vpop.f32.mrf.mxu1 }
 0x1f1   : > { %v628_v21 = vadd.f32 %v1029_v19, %v627_v20 }
 0x1f2   : > { %v1084_v22 = vpop.f32.mrf.mxu1 }
 0x1f3   : > { %v631_v23 = vmax.f32 %v628_v21, 0.0 }
 0x1f5   : > { %1094 = vmatmul.mubr.msk.f32.vlgmr.msra.gmra.mxu0 %vm472_vm1, %v631_v23 }
 0x1f6   : > { %1115 = vmatprep.mubr.msk.f32.mxu0 %vm1418_vm0, %v1417_v0  ;;  %1108 = vmatpush3.msra.mxu0 %v819_v28 }
 0x1f7   : > { %1109 = vmatprep.subr.mxu0 %v1417_v0 }
 0x1f8   : > { %1110 = vmatpush3.msra.mxu0 %v818_v43 }
 0x1f9   : > { %1111 = vmatprep.subr.mxu0 %v1417_v0 }
 0x1fa   : > { %1112 = vmatpush3.msra.mxu0 %v817_v44 }
 0x1fb   : > { %1113 = vmatprep.subr.mxu0 %v1417_v0 }
 0x1fc   : > { %1114 = vmatpush3.msra.mxu0 %v816_v45 }
 0x2b5   : > { %v712_v30 = vpop.f32.mrf.mxu0 }
 0x2b6   : > { %v713_v31 = vadd.f32 %v1031_v29, %v712_v30 }
 0x2b7   : > { %v1095_v32 = vpop.f32.mrf.mxu0 }
 0x2b8   : > { %v716_v33 = vsel %vm472_vm1, %v713_v31, 0.0 }
 0x2b9   : > { %v717_v34 = vrot.slane %v716_v33, 4 }
 0x2bb   : > { %v718_v35 = vadd.f32 %v717_v34, %v716_v33 }
 0x2bd   : > { %v719_v36 = vrot.slane %v718_v35, 2 }
 0x2bf   : > { %v720_v37 = vadd.f32 %v719_v36, %v718_v35 }
 0x2c1   : > { %v721_v38 = vrot.slane %v720_v37, 1 }
 0x2c3   : > { %v722_v40 = vadd.f32 %v721_v38, %v720_v37 }
 0x2c5   : > { %v730_v41 = vadd.f32 %v729_v39, %v722_v40 }
 0x2c7   : > { %732 = vst.msk [vmem:[#allocation2] sm:$0x1] %vm727_vm2, %v730_v41 }
 0x2ce   : > { %v736_v42 = vld [vmem:[#allocation2] sm:$0x1] }
 0x2cf   : > { %1105 = vmatmul.mubr.msk.f32.vlgmr.msra.gmra.mxu1 %vm472_vm1, %v736_v42 }
 0x38f   : > { %v811_v47 = vpop.f32.mrf.mxu1 }
 0x390   : > { %v812_v48 = vadd.f32 %v811_v47, %v741_v46 }
 0x391   : > { %v1106_v49 = vpop.f32.mrf.mxu1 }
 0x392   : > { %v815_v50 = vmax.f32 %v812_v48, 0.0 }
 0x394   : > { %1116 = vmatmul.mubr.msk.f32.vlgmr.msra.gmra.mxu0 %vm472_vm1, %v815_v50 }
 0x454   : > { %v890_v52 = vpop.f32.mrf.mxu0 }
 0x455   : > { %v891_v53 = vadd.f32 %v890_v52, %v820_v51 }
 0x456   : > { %v1117_v54 = vpop.f32.mrf.mxu0 }
 0x457   : > { %895 = vst.msk [vmem:[%s459_s23] sm:$0x1] %vm894_vm3, %v891_v53 }
 0x458   : > { %1334 = shalt.err (!%p1331_p13)
}
 0x459   : > { %s1335_s26 = scalar_lea.hbm %s1709_s7, 16  ;;  %s1339_s24 = scalar_lea.hbm %s1792_s5, 32 }
 0x45a   : > { %p1336_p1 = scmp.ne.s32.totalorder %s1709_s7, %s1335_s26  ;;  %p1340_p12 = scmp.lt.s32.totalorder %s1709_s7, %s1792_s5 }
 0x45b   : > { %p1341_p5 = scmp.lt.s32.totalorder %s1339_s24, %s1335_s26 }
 0x45c   : > { %p1337_p4 = pnand %p1336_p1, %p1580_p0 }
 0x45d   : > { %p1342_p3 = por %p1341_p5, %p1340_p12 }
 0x45e   : > { %p1338_p8 = pneg %p1337_p4 }
 0x460   : > { %p1343_p10 = pnand %p1342_p3, %p1338_p8 }
 0x462   : > { %1346 = shalt.err (!%p1343_p10)
}
 0x463   : > { %1132 = dma.vmem_to_hbm [thread:$0]  (%p1580_p0), %s910_s28, 16, %s1709_s7, %s897_s27  }
 0x464 PF: > { %s1793_s23 = sld [smem:[#allocation16_spill]]  ;;  %p1796_p11 = scmp.ge.s32.totalorder %s1409_s22, 2 }
 0x465   : > { %s1794_s17 = sld [smem:[#allocation17_spill]] }
 0x46a   : > { %s921_s3 = sand.u32 1, %s1793_s23  }
 0x46b   : > { %p1795_p2 = scmp.ne.s32.totalorder %s1794_s17, 0  ;;  %s922_s25 = scalar_lea.sflag [#allocation5], %s921_s3 }
 0x46d   : > { %p1149_p7 = pnand %p1796_p11, %p1795_p2 }
 0x46f   : > { %p1150_p6 = pneg %p1149_p7 }
 0x471   : > { %1384 = dma.done.wait (%p1150_p6), %s922_s25, 16  }
 0x472   : > { %1386 = vsyncadd (%p1150_p6), %s922_s25, 4294967280  ;;  %s29_s22 = sadd.s32 1, %s1409_s22   ;;  %s1797_s13 = sld [smem:[#allocation18_spill]] }
 0x473   : > { %p26_p9 = scmp.ge.s32.totalorder %s29_s22, 4   ;;  %s1798_s17 = smov %s1393_s18 }
 0x474   : > { %s1799_s18 = smov %s1397_s19  ;;  %s1800_s19 = smov %s1592_s14 }
 0x475   : > { %s1801_s20 = smov %s1405_s21  ;;  %28 = sbr.rel (!%p26_p9) target bundleno = 13 (0xd), region = 129 }
 0x478   : > { %s1802_s21 = smov %s1797_s13 }
 0x47a   :  { %926 = vsyncpa [#allocation4], 1 }
 0x47b   :  { %928 = vsyncpa [#allocation4 + $0x1], 1 }
 0x47c   :  { %929 = vsyncpa [#allocation7], 1 }
 0x47d   :  { %930 = vsyncpa [#allocation10], 1 }
 0x47e   :  { %931 = vsyncpa [#allocation5], 1 }
 0x47f   :  { %933 = vsyncpa [#allocation5 + $0x1], 1 }

</bundles_post_ra>
